<compile_context>
chip_gen: v7x
topology: tpu7x:2x2x1
jax: 0.10.0
libtpu: 0.0.40
codegen_flags: <defaults>
</compile_context>

<pallas_src>
import jax
import jax.numpy as jnp
from jax.experimental import pallas as pl
from jax.experimental.pallas import tpu as pltpu


def _pooler_kernel(cls_ref, w_ref, b_ref, out_ref):
    # cls_ref: [B_pad, H_in]  compute dtype, resident across the grid
    # w_ref:   [TN, H_in]     compute dtype, streamed tile of PyTorch [out, in] weight
    # b_ref:   [1, TN]        f32 bias tile
    # out_ref: [B_pad, TN]
    x = cls_ref[...]
    w = w_ref[...]
    # y = x @ W.T  -- transpose folded into the contraction dims (no wrapper weight.T).
    y = jax.lax.dot_general(
        x, w,
        dimension_numbers=(((1,), (1,)), ((), ())),
        preferred_element_type=jnp.float32,
    )
    y = y + b_ref[...]                        # f32 bias add, broadcast over batch
    out_ref[...] = jnp.tanh(y).astype(out_ref.dtype)


def bert_pooler(hidden_states, weight, bias, *,
                compute_dtype=jnp.bfloat16, block_n=256):
    """BERT pooler: tanh(hidden_states[:, 0] @ weight.T + bias).

    hidden_states: [B, S, H]; weight: [H_out, H_in] (PyTorch layout); bias: [H_out].
    compute_dtype: matmul operand dtype. bf16 halves weight HBM traffic (default);
    jnp.float32 reproduces the module bit-faithfully.
    """
    B, S, H = hidden_states.shape
    H_out, H_in = weight.shape
    assert H_in == H and bias.shape == (H_out,)
    out_dtype = hidden_states.dtype

    # CLS slice is O(B*H) glue, negligible vs. the H_out*H_in weight read.
    # TODO(synk): fold the seq-0 slice into the cls BlockSpec ((B, 1, H) block over
    # [B, S, H]) once small second-minor blocks are guaranteed on all target chips.
    cls = hidden_states[:, 0, :].astype(compute_dtype)

    # Pad batch (sublane dim) to a full vreg row: 8 rows for 32-bit, 16 for 16-bit.
    c_item = jnp.dtype(compute_dtype).itemsize
    o_item = jnp.dtype(out_dtype).itemsize
    sublanes = 8 * (4 // c_item)
    b_pad = pl.cdiv(B, sublanes) * sublanes
    if b_pad != B:
        cls = jnp.pad(cls, ((0, b_pad - B), (0, 0)))

    # Weight kept in [out, in] layout; store it in compute_dtype upstream to make
    # this cast a no-op.
    w = weight.astype(compute_dtype)
    b2d = bias.astype(jnp.float32).reshape(1, H_out)

    # Output-dim tile the grid streams over (lane-dense: 256 divides 768/1024/...).
    tn = min(block_n, H_out)
    if H_out % tn != 0:            # tiny / odd H_out -> single full tile
        tn = H_out
    grid_n = H_out // tn

    # Explicit scoped-VMEM budget: rough double-buffered footprint, kept well
    # inside every generation's limit (v7x physical VMEM is 64 MiB).
    vmem_needed = 2 * (b_pad * H_in * c_item + tn * H_in * c_item
                       + tn * 4 + b_pad * tn * o_item)
    vmem_limit = int(min(32 * 1024 * 1024, max(4 * vmem_needed, 8 * 1024 * 1024)))

    cost = pl.CostEstimate(
        flops=2 * b_pad * H_out * H_in,
        transcendentals=b_pad * H_out,
        bytes_accessed=(H_out * H_in * c_item + b_pad * H_in * c_item
                        + H_out * 4 + b_pad * H_out * o_item),
    )

    out_padded = pl.pallas_call(
        _pooler_kernel,
        out_shape=jax.ShapeDtypeStruct((b_pad, H_out), out_dtype),
        grid_spec=pltpu.PrefetchScalarGridSpec(
            num_scalar_prefetch=0,
            grid=(grid_n,),
            in_specs=[
                pl.BlockSpec((b_pad, H_in), lambda j: (0, 0)),   # cls: resident
                pl.BlockSpec((tn, H_in), lambda j: (j, 0)),      # weight: streamed tiles
                pl.BlockSpec((1, tn), lambda j: (0, j)),         # bias tile
            ],
            out_specs=pl.BlockSpec((b_pad, tn), lambda j: (0, j)),
        ),
        compiler_params=pltpu.CompilerParams(
            dimension_semantics=("parallel",),   # v7x: split weight tiles across 2 TCs
            vmem_limit_bytes=vmem_limit,
        ),
        cost_estimate=cost,
    )(cls, w, b2d)

    return out_padded[:B]


if __name__ == "__main__":
    # Small shapes consistent with the module's forward: [B, S, H]
    B, S, H = 2, 8, 32

    key = jax.random.PRNGKey(0)
    k_x, k_w, k_b = jax.random.split(key, 3)

    hidden_states = jax.random.normal(k_x, (B, S, H), dtype=jnp.float32)
    # Deterministic init mimicking nn.Linear(hidden, hidden) (std ~ initializer_range)
    weight = jax.random.normal(k_w, (H, H), dtype=jnp.float32) * 0.02
    bias = jax.random.normal(k_b, (H,), dtype=jnp.float32) * 0.02

    cls = hidden_states[:, 0, :]
    ref_f32 = jnp.tanh(cls @ weight.T + bias)

    # Exact-semantics path (f32 compute): matches nn.Linear + Tanh.
    out_f32 = jax.block_until_ready(
        bert_pooler(hidden_states, weight, bias, compute_dtype=jnp.float32))
    assert out_f32.shape == (B, H)
    assert jnp.allclose(out_f32, ref_f32, atol=1e-4, rtol=1e-4)

    # Default performance path (bf16 operands, f32 accumulation).
    out = jax.block_until_ready(bert_pooler(hidden_states, weight, bias))
    assert out.shape == (B, H)
    ref_mixed = jnp.tanh(
        cls.astype(jnp.bfloat16).astype(jnp.float32)
        @ weight.astype(jnp.bfloat16).astype(jnp.float32).T + bias)
    assert jnp.allclose(out, ref_mixed, atol=1e-3, rtol=1e-3)
    assert jnp.allclose(out, ref_f32, atol=3e-2, rtol=3e-2)

    print("KERNEL_OK")
</pallas_src>

<mosaic_0001>
module attributes {stable_mosaic.version = 11 : i64} {
  func.func @_pooler_kernel(%arg0: i32, %arg1: memref<8x32xf32, #tpu.memory_space<vmem>>, %arg2: memref<32x32xf32, #tpu.memory_space<vmem>>, %arg3: memref<1x32xf32, #tpu.memory_space<vmem>>, %arg4: memref<8x32xf32, #tpu.memory_space<vmem>>) attributes {dimension_semantics = [#tpu.dimension_semantics<parallel>], iteration_bounds = array<i64: 1>, scalar_prefetch = 0 : i64, scratch_operands = 0 : i64, tpu.core_type = #tpu.core_type<tc>, window_params = [{pipeline_mode = #tpu.pipeline_mode<synchronous>, transform_indices = @transform_0, window_bounds = array<i64: 8, 32>}, {transform_indices = @transform_1, window_bounds = array<i64: 32, 32>}, {transform_indices = @transform_2, window_bounds = array<i64: 1, 32>}, {transform_indices = @transform_3, window_bounds = array<i64: 8, 32>}]} {
    %c0 = arith.constant 0 : index
    %c0_0 = arith.constant 0 : index
    %0 = vector.load %arg1[%c0, %c0_0] : memref<8x32xf32, #tpu.memory_space<vmem>>, vector<8x32xf32>
    %c0_1 = arith.constant 0 : index
    %c0_2 = arith.constant 0 : index
    %1 = vector.load %arg2[%c0_1, %c0_2] : memref<32x32xf32, #tpu.memory_space<vmem>>, vector<32x32xf32>
    %cst = arith.constant dense<0.000000e+00> : vector<8x32xf32>
    %2 = tpu.matmul %0, %1, %cst {dimension_numbers = #tpu.dot_dimension_numbers<[1], [1], [0], [0], [0, 0, 1, 0], [], []>} : vector<8x32xf32>, vector<32x32xf32>, vector<8x32xf32> -> vector<8x32xf32>
    %c0_3 = arith.constant 0 : index
    %c0_4 = arith.constant 0 : index
    %3 = vector.load %arg3[%c0_3, %c0_4] : memref<1x32xf32, #tpu.memory_space<vmem>>, vector<1x32xf32>
    %4 = vector.broadcast %3 : vector<1x32xf32> to vector<8x32xf32>
    %5 = arith.addf %2, %4 : vector<8x32xf32>
    %6 = math.tanh %5 : vector<8x32xf32>
    %c0_5 = arith.constant 0 : index
    %c0_6 = arith.constant 0 : index
    %7 = vector.load %arg4[%c0_5, %c0_6] : memref<8x32xf32, #tpu.memory_space<vmem>>, vector<8x32xf32>
    tpu.vector_store %arg4[%c0_5, %c0_6], %6 {strides = array<i32>} : memref<8x32xf32, #tpu.memory_space<vmem>>, vector<8x32xf32>,
    return
  }
  func.func @transform_0(%arg0: i32) -> (i32, i32) {
    %c0_i32 = arith.constant 0 : i32
    %c0_i32_0 = arith.constant 0 : i32
    %c0_i32_1 = arith.constant 0 : i32
    return %c0_i32, %c0_i32_0 : i32, i32
  }
  func.func @transform_1(%arg0: i32) -> (i32, i32) {
    %c0_i32 = arith.constant 0 : i32
    %c0_i32_0 = arith.constant 0 : i32
    return %arg0, %c0_i32 : i32, i32
  }
  func.func @transform_2(%arg0: i32) -> (i32, i32) {
    %c0_i32 = arith.constant 0 : i32
    %c0_i32_0 = arith.constant 0 : i32
    return %c0_i32, %arg0 : i32, i32
  }
  func.func @transform_3(%arg0: i32) -> (i32, i32) {
    %c0_i32 = arith.constant 0 : i32
    %c0_i32_0 = arith.constant 0 : i32
    return %c0_i32, %arg0 : i32, i32
  }
}

</mosaic_0001>

<bundles_post_ra>
// kernel: tpu_custom_call.1
= control target key start
LH: loop header
LB: loop body
LE: loop exit
PB: predicated region body
PF: predicated region fallthrough
CT: control target
= control target key end

     0   :  { %8 = vsyncpa [#allocation3], 0  ;;  %s347_s0 = inlined_call_operand.hbm [shape: f32[8,32], index: 0, kind: input, shape index: {}]   ;;  %s348_s1 = inlined_call_operand.hbm [shape: f32[32,32], index: 1, kind: input, shape index: {}]   ;;  %s349_s2 = inlined_call_operand.vmem [shape: f32[1,32], index: 2, kind: input, shape index: {}]   ;;  %s350_s3 = inlined_call_operand.hbm [shape: f32[8,32], index: 3, kind: output, shape index: {}]  }
   0x1   :  { %9 = vsyncpa [#allocation6], 0 }
   0x2   :  { %10 = vsyncpa [#allocation4], 0  ;;  %s269_s12 = smov [#allocation2]   ;;  %s270_s14 = smov [#allocation5]  }
   0x3   :  { %s17_s13 = sshll.u32 %s269_s12, 4  ;;  %s26_s15 = sshll.u32 %s270_s14, 4  ;;  %s18_s13 = int_to_ptr.vmem [resolvable:$true] %s17_s13  ;;  %s297_s15 = int_to_ptr.vmem [resolvable:$true] %s26_s15 }
   0x4   :  { %s197_s18 = scalar_lea.hbm %s347_s0, 128 }
   0x5   :  { %p198_p0 = scmp.ne.s32.totalorder %s347_s0, %s197_s18  ;;  %p201_p1 = scmp.lt.u32.totalorder %s197_s18, %s347_s0 }
   0x7   :  { %p203_p2 = pnand %p201_p1, %p198_p0 }
   0x9   :  { %206 = shalt.err (!%p203_p2)
}
   0xa   :  { %s207_s23 = scalar_lea.vmem %s18_s13, 128  ;;  %p212_p4 = scmp.lt.s32.totalorder %s18_s13, %s18_s13 }
   0xb   :  { %p208_p3 = scmp.ne.s32.totalorder %s18_s13, %s207_s23  ;;  %p213_p5 = scmp.lt.s32.totalorder %s207_s23, %s207_s23 }
   0xd   :  { %p214_p6 = por %p213_p5, %p212_p4 }
   0xf   :  { %p215_p7 = pnand %p214_p6, %p208_p3 }
  0x11   :  { %218 = shalt.err (!%p215_p7)
}
  0x12   :  { %20 = dma.hbm_to_vmem [thread:$0]  %s347_s0, 128, %s18_s13, [#allocation3]  }
  0x13   :  { %s219_s28 = scalar_lea.hbm %s348_s1, 512 }
  0x14   :  { %p220_p8 = scmp.ne.s32.totalorder %s348_s1, %s219_s28  ;;  %p223_p9 = scmp.lt.u32.totalorder %s219_s28, %s348_s1 }
  0x16   :  { %p225_p10 = pnand %p223_p9, %p220_p8 }
  0x18   :  { %228 = shalt.err (!%p225_p10)
}
  0x19   :  { %s229_s6 = scalar_lea.vmem %s297_s15, 512  ;;  %p234_p12 = scmp.lt.s32.totalorder %s297_s15, %s297_s15 }
  0x1a   :  { %p230_p11 = scmp.ne.s32.totalorder %s297_s15, %s229_s6  ;;  %p235_p13 = scmp.lt.s32.totalorder %s229_s6, %s229_s6 }
  0x1c   :  { %p236_p0 = por %p235_p13, %p234_p12 }
  0x1e   :  { %p237_p1 = pnand %p236_p0, %p230_p11 }
  0x20   :  { %240 = shalt.err (!%p237_p1)
}
  0x21   :  { %s271_s0 = smov 128   ;;  %s272_s7 = smov 8  }
  0x22   :  { %32 = dma.hbm_to_vmem [thread:$0]  %s348_s1, 512, %s297_s15, [#allocation6], %s271_s0, %s271_s0, %s272_s7  }
  0x23   :  { %263 = dma.done.wait [#allocation3], 128  }
  0x24   :  { %264 = vsyncadd [#allocation3], 4294967168 }
  0x25   :  { %265 = dma.done.wait [#allocation6], 512  }
  0x26   :  { %266 = vsyncadd [#allocation6], 4294966784  ;;  %v273_v0 = vmov 0.0|0.0   ;;  %vm274_vm0 = vmmov 0   ;;  %v275_v1 = vmov 0.0   ;;  %vm53_vm1 = vcmask 261120  }
  0x27   :  { %179 = vmatprep.subr.bf16.mxu0 %v273_v0  ;;  %176 = vmatprep.mubr.msk.f32.mxu0 %vm274_vm0, %v275_v1  ;;  %v42_v2 = vld [vmem:[#allocation5] sm:$0xff]  ;;  %v43_v3 = vld [vmem:[#allocation5 + $0x8] sm:$0xff]  ;;  %vm181_vm2 = vmpackc.low %vm53_vm1, %vm53_vm1  ;;  %s276_s11 = smov [#allocation7]  }
  0x28   :  { %v180_v4 = vpack.c.bf16 %v43_v3, %v42_v2  ;;  %v44_v5 = vld [vmem:[#allocation5 + $0x10] sm:$0xff]  ;;  %v45_v6 = vld [vmem:[#allocation5 + $0x18] sm:$0xff]  ;;  %s147_s12 = sshll.u32 %s276_s11, 4  ;;  %s148_s12 = int_to_ptr.vmem [resolvable:$true] %s147_s12 }
  0x29   :  { %v184_v7 = vpack.c.bf16 %v45_v6, %v44_v5  ;;  %v41_v8 = vld [vmem:[#allocation2] sm:$0xff]  ;;  %s241_s13 = scalar_lea.vmem %s148_s12, 128  ;;  %p246_p3 = scmp.lt.s32.totalorder %s148_s12, %s148_s12 }
  0x2a   :  { %182 = vmatpush3.bf16.xpose.msk.msra.mxu0 %vm181_vm2, %v180_v4  ;;  %v157_v9 = vld [vmem:[%s349_s2] ss:$0 sm:$0xff]  ;;  %p242_p2 = scmp.ne.s32.totalorder %s148_s12, %s241_s13  ;;  %p247_p4 = scmp.lt.s32.totalorder %s241_s13, %s241_s13 }
  0x2b   :  { %183 = vmatprep.subr.bf16.mxu0 %v273_v0 }
  0x2c   :  { %p248_p5 = por %p247_p4, %p246_p3 }
  0x2e   :  { %p249_p6 = pnand %p248_p5, %p242_p2 }
  0x32   :  { %186 = vmatpush3.bf16.xpose.msk.msra.mxu0 %vm181_vm2, %v184_v7 }
  0x39   :  { %177 = vmatmul.mubr.msk.f32.vlgmr.msra.gmra.mrb[0].mxu0 %vm53_vm1, %v41_v8 }
 0x10c   :  { %v135_v10 = vpop.f32.mrb[0].mxu0 }
 0x10d   :  { %v136_v11 = vadd.f32 %v157_v9, %v135_v10  ;;  %v178_v12 = vpop.f32.mrb[1].mxu0 }
 0x10f   :  { %195 = vtanh.f32 %v136_v11 }
 0x119   :  { %v196_v13 = vpop.eup %195 }
 0x11a   :  { %140 = vst.msk [vmem:[#allocation7] sm:$0xff] %vm53_vm1, %v196_v13 }
 0x11b   :  { %252 = shalt.err (!%p249_p6)
}
 0x11c   :  { %s253_s2 = scalar_lea.hbm %s350_s3, 128 }
 0x11d   :  { %p254_p7 = scmp.ne.s32.totalorder %s350_s3, %s253_s2  ;;  %p257_p8 = scmp.lt.u32.totalorder %s253_s2, %s350_s3 }
 0x11f   :  { %p259_p9 = pnand %p257_p8, %p254_p7 }
 0x121   :  { %262 = shalt.err (!%p259_p9)
}
 0x122   :  { %150 = dma.vmem_to_hbm [thread:$0]  %s148_s12, 128, %s350_s3, [#allocation4]  }
 0x123   :  { %267 = dma.done.wait [#allocation4], 128  }
 0x124   :  { %268 = vsyncadd [#allocation4], 4294967168 }
 0x125   :  { %154 = vsyncpa [#allocation3], 1 }
 0x126   :  { %155 = vsyncpa [#allocation6], 1 }
 0x127   :  { %156 = vsyncpa [#allocation4], 1 }

</bundles_post_ra>
